<compile_context>
chip_gen: v7x
topology: tpu7x:2x2x1
jax: 0.10.0
libtpu: 0.0.40
codegen_flags: <defaults>
</compile_context>

<pallas_src>
import functools

import jax
import jax.numpy as jnp
from jax.experimental import pallas as pl
from jax.experimental.pallas import tpu as pltpu

H1_DIM = 128                 # hidden width of the PyTorch module
_TB_MAX = 1024               # max batch-tile rows (multiple of 8)
_VMEM_BUDGET = 8 * 1024 * 1024  # conservative; fits v5e's 16 MiB scoped default


def _precision_for(dtype):
    # Full-f32 MXU passes when staying in f32; default (fast) path otherwise.
    return jax.lax.Precision.HIGHEST if dtype == jnp.float32 else None


def _choose_batch_tile(batch, s_dim, a_dim):
    """Pick the batch tile TB and the padded batch size."""
    weight_bytes = 4 * (s_dim * H1_DIM + H1_DIM * a_dim + s_dim * a_dim + 2 * H1_DIM)
    budget = max(_VMEM_BUDGET - 2 * weight_bytes, 1 << 20)
    # double-buffered x and out tiles + f32 (TB, 128) intermediate, per row
    bytes_per_row = 4 * (2 * s_dim + 2 * a_dim + H1_DIM)
    tb = min(_TB_MAX, max(8, budget // bytes_per_row))
    tb = max(8, (tb // 8) * 8)
    if batch <= tb:
        # One block covering the whole (possibly non-multiple-of-8) batch:
        # block == full array dim satisfies the tiling constraint, no padding.
        return batch, batch
    padded = pl.cdiv(batch, tb) * tb
    return tb, padded


# ---------------------------------------------------------------------------
# Kernels
# ---------------------------------------------------------------------------
def _folded_kernel(x_ref, w_ref, b_ref, o_ref, *, mxu_dtype):
    """y = x @ W + b  with pre-folded (s_dim, a_dim) weight."""
    x = x_ref[...].astype(mxu_dtype)
    w = w_ref[...].astype(mxu_dtype)
    y = jnp.dot(x, w, preferred_element_type=jnp.float32,
                precision=_precision_for(mxu_dtype))
    o_ref[...] = (y + b_ref[...]).astype(o_ref.dtype)


def _two_layer_kernel(x_ref, w1_ref, b1_ref, w2_ref, b2_ref, o_ref, *, mxu_dtype):
    """y = (x @ W1^T + b1) @ W2^T + b2, weights kept in PyTorch (out, in) layout.

    Contraction is done in-kernel over dim 1 of each weight (no wrapper-side
    jnp.transpose and no extra HBM pass over the weights per forward call).
    """
    prec = _precision_for(mxu_dtype)
    dn = (((1,), (1,)), ((), ()))  # contract x/h dim 1 with weight dim 1
    x = x_ref[...].astype(mxu_dtype)
    h = jax.lax.dot_general(x, w1_ref[...].astype(mxu_dtype), dn,
                            preferred_element_type=jnp.float32,
                            precision=prec) + b1_ref[...]
    y = jax.lax.dot_general(h.astype(mxu_dtype), w2_ref[...].astype(mxu_dtype), dn,
                            preferred_element_type=jnp.float32,
                            precision=prec) + b2_ref[...]
    o_ref[...] = y.astype(o_ref.dtype)


# ---------------------------------------------------------------------------
# Wrappers
# ---------------------------------------------------------------------------
def fold_params(w1, b1, w2, b2):
    """Fold the two bias-only linear layers into one affine map.

    ONLY valid because QN_linear has NO nonlinearity between l1 and l2.
    Call once per parameter update, not per forward step.
    """
    hi = jax.lax.Precision.HIGHEST
    w = jnp.transpose(jnp.dot(w2, w1, precision=hi))          # (s_dim, a_dim)
    b = jnp.dot(b1, jnp.transpose(w2), precision=hi) + b2      # (a_dim,)
    return w, b


@functools.partial(jax.jit, static_argnames=("mxu_dtype",))
def qn_linear_forward_folded(x, w_folded, b_folded, *, mxu_dtype=jnp.float32):
    """Fast path: single batch-tiled matmul with pre-folded parameters."""
    batch, s_dim = x.shape
    a_dim = w_folded.shape[1]
    tb, padded_b = _choose_batch_tile(batch, s_dim, a_dim)
    xp = x if padded_b == batch else jnp.pad(x, ((0, padded_b - batch), (0, 0)))

    out = pl.pallas_call(
        functools.partial(_folded_kernel, mxu_dtype=mxu_dtype),
        out_shape=jax.ShapeDtypeStruct((padded_b, a_dim), jnp.float32),
        grid=(padded_b // tb,),
        in_specs=[
            pl.BlockSpec((tb, s_dim), lambda i: (i, 0)),       # x: tiled over batch
            pl.BlockSpec((s_dim, a_dim), lambda i: (0, 0)),    # W: VMEM-resident
            pl.BlockSpec((1, a_dim), lambda i: (0, 0)),        # b: VMEM-resident
        ],
        out_specs=pl.BlockSpec((tb, a_dim), lambda i: (i, 0)),
        compiler_params=pltpu.CompilerParams(
            dimension_semantics=("parallel",)),                # megacore on v7x
    )(xp, w_folded, b_folded.reshape(1, -1))
    return out[:batch] if padded_b != batch else out


@functools.partial(jax.jit, static_argnames=("mxu_dtype",))
def qn_linear_forward(x, w1, b1, w2, b2, *, mxu_dtype=jnp.float32):
    """Two-layer path (kept for when an activation is added between l1/l2)."""
    batch, s_dim = x.shape
    a_dim, h1 = w2.shape
    tb, padded_b = _choose_batch_tile(batch, s_dim, a_dim)
    xp = x if padded_b == batch else jnp.pad(x, ((0, padded_b - batch), (0, 0)))

    out = pl.pallas_call(
        functools.partial(_two_layer_kernel, mxu_dtype=mxu_dtype),
        out_shape=jax.ShapeDtypeStruct((padded_b, a_dim), jnp.float32),
        grid=(padded_b // tb,),
        in_specs=[
            pl.BlockSpec((tb, s_dim), lambda i: (i, 0)),       # x: tiled over batch
            pl.BlockSpec((h1, s_dim), lambda i: (0, 0)),       # W1 (out,in): resident
            pl.BlockSpec((1, h1), lambda i: (0, 0)),           # b1: resident
            pl.BlockSpec((a_dim, h1), lambda i: (0, 0)),       # W2 (out,in): resident
            pl.BlockSpec((1, a_dim), lambda i: (0, 0)),        # b2: resident
        ],
        out_specs=pl.BlockSpec((tb, a_dim), lambda i: (i, 0)),
        compiler_params=pltpu.CompilerParams(
            dimension_semantics=("parallel",)),
    )(xp, w1, b1.reshape(1, -1), w2, b2.reshape(1, -1))
    return out[:batch] if padded_b != batch else out


# ---------------------------------------------------------------------------
# Init + reference
# ---------------------------------------------------------------------------
def init_params(key, s_dim, a_dim, h1_dim=H1_DIM):
    """Deterministic PyTorch-style (uniform +/- 1/sqrt(fan_in)) init."""
    k1, k2, k3, k4 = jax.random.split(key, 4)
    bound1 = 1.0 / jnp.sqrt(jnp.float32(s_dim))
    bound2 = 1.0 / jnp.sqrt(jnp.float32(h1_dim))
    w1 = jax.random.uniform(k1, (h1_dim, s_dim), jnp.float32, -bound1, bound1)
    b1 = jax.random.uniform(k2, (h1_dim,), jnp.float32, -bound1, bound1)
    w2 = jax.random.uniform(k3, (a_dim, h1_dim), jnp.float32, -bound2, bound2)
    b2 = jax.random.uniform(k4, (a_dim,), jnp.float32, -bound2, bound2)
    return w1, b1, w2, b2


def reference_forward(x, w1, b1, w2, b2):
    hi = jax.lax.Precision.HIGHEST
    h = jnp.dot(x, w1.T, precision=hi) + b1
    return jnp.dot(h, w2.T, precision=hi) + b2


if __name__ == "__main__":
    # Small shapes consistent with a DQN state/action space (CartPole-ish).
    s_dim, a_dim = 4, 2
    key = jax.random.PRNGKey(0)
    kx_small, kx_big, kp = jax.random.split(key, 3)

    w1, b1, w2, b2 = init_params(kp, s_dim, a_dim)
    w_f, b_f = fold_params(w1, b1, w2, b2)   # once per parameter update

    ok = True
    # (batch, key): tiny demo batch + a larger batch that exercises the tiled
    # grid (multiple steps + pad-and-slice on the batch axis).
    for batch, kb in ((2, kx_small), (2000, kx_big)):
        x = jax.random.normal(kb, (batch, s_dim), jnp.float32)
        ref = reference_forward(x, w1, b1, w2, b2)

        y_fold = jax.block_until_ready(qn_linear_forward_folded(x, w_f, b_f))
        y_two = jax.block_until_ready(qn_linear_forward(x, w1, b1, w2, b2))

        ok &= (y_fold.shape == (batch, a_dim)) and (y_two.shape == (batch, a_dim))
        ok &= bool(jnp.allclose(y_fold, ref, atol=1e-4, rtol=1e-4))
        ok &= bool(jnp.allclose(y_two, ref, atol=1e-4, rtol=1e-4))

    if not ok:
        raise SystemExit("QN_linear Pallas kernel mismatch vs reference")
    print("KERNEL_OK")
</pallas_src>

<mosaic_0001>
module attributes {stable_mosaic.version = 11 : i64} {
  func.func @_folded_kernel(%arg0: i32, %arg1: memref<2x4xf32, #tpu.memory_space<vmem>>, %arg2: memref<4x2xf32, #tpu.memory_space<vmem>>, %arg3: memref<1x2xf32, #tpu.memory_space<vmem>>, %arg4: memref<2x2xf32, #tpu.memory_space<vmem>>) attributes {dimension_semantics = [#tpu.dimension_semantics<parallel>], iteration_bounds = array<i64: 1>, scalar_prefetch = 0 : i64, scratch_operands = 0 : i64, tpu.core_type = #tpu.core_type<tc>, window_params = [{transform_indices = @transform_0, window_bounds = array<i64: 2, 4>}, {pipeline_mode = #tpu.pipeline_mode<synchronous>, transform_indices = @transform_1, window_bounds = array<i64: 4, 2>}, {pipeline_mode = #tpu.pipeline_mode<synchronous>, transform_indices = @transform_2, window_bounds = array<i64: 1, 2>}, {transform_indices = @transform_3, window_bounds = array<i64: 2, 2>}]} {
    %c0 = arith.constant 0 : index
    %c0_0 = arith.constant 0 : index
    %0 = vector.load %arg1[%c0, %c0_0] : memref<2x4xf32, #tpu.memory_space<vmem>>, vector<2x4xf32>
    %c0_1 = arith.constant 0 : index
    %c0_2 = arith.constant 0 : index
    %1 = vector.load %arg2[%c0_1, %c0_2] : memref<4x2xf32, #tpu.memory_space<vmem>>, vector<4x2xf32>
    %cst = arith.constant dense<0.000000e+00> : vector<2x2xf32>
    %2 = tpu.matmul %0, %1, %cst {dimension_numbers = #tpu.dot_dimension_numbers<[1], [0], [0], [1], [0, 0, 1, 1], [], []>, precision = #tpu.contract_precision<fp32>} : vector<2x4xf32>, vector<4x2xf32>, vector<2x2xf32> -> vector<2x2xf32>
    %c0_3 = arith.constant 0 : index
    %c0_4 = arith.constant 0 : index
    %3 = vector.load %arg3[%c0_3, %c0_4] : memref<1x2xf32, #tpu.memory_space<vmem>>, vector<1x2xf32>
    %4 = vector.broadcast %3 : vector<1x2xf32> to vector<2x2xf32>
    %5 = arith.addf %2, %4 : vector<2x2xf32>
    %c0_5 = arith.constant 0 : index
    %c0_6 = arith.constant 0 : index
    %6 = vector.load %arg4[%c0_5, %c0_6] : memref<2x2xf32, #tpu.memory_space<vmem>>, vector<2x2xf32>
    tpu.vector_store %arg4[%c0_5, %c0_6], %5 {strides = array<i32>} : memref<2x2xf32, #tpu.memory_space<vmem>>, vector<2x2xf32>,
    return
  }
  func.func @transform_0(%arg0: i32) -> (i32, i32) {
    %c0_i32 = arith.constant 0 : i32
    %c0_i32_0 = arith.constant 0 : i32
    return %arg0, %c0_i32 : i32, i32
  }
  func.func @transform_1(%arg0: i32) -> (i32, i32) {
    %c0_i32 = arith.constant 0 : i32
    %c0_i32_0 = arith.constant 0 : i32
    %c0_i32_1 = arith.constant 0 : i32
    return %c0_i32, %c0_i32_0 : i32, i32
  }
  func.func @transform_2(%arg0: i32) -> (i32, i32) {
    %c0_i32 = arith.constant 0 : i32
    %c0_i32_0 = arith.constant 0 : i32
    %c0_i32_1 = arith.constant 0 : i32
    return %c0_i32, %c0_i32_0 : i32, i32
  }
  func.func @transform_3(%arg0: i32) -> (i32, i32) {
    %c0_i32 = arith.constant 0 : i32
    %c0_i32_0 = arith.constant 0 : i32
    return %arg0, %c0_i32 : i32, i32
  }
}

</mosaic_0001>

<bundles_post_ra>
// kernel: qn_linear_forward_folded.1
= control target key start
LH: loop header
LB: loop body
LE: loop exit
PB: predicated region body
PF: predicated region fallthrough
CT: control target
= control target key end

     0   :  { %vm28_vm0 = vcmask 1043456   ;;  %vm24_vm1 = vcmask 31744   ;;  %v574_v1 = vmov 0.0   ;;  %vm575_vm2 = vmmov 0   ;;  %s624_s0 = inlined_call_operand.vmem [shape: f32[2,4], index: 0, kind: input, shape index: {}]   ;;  %s625_s1 = inlined_call_operand.vmem [shape: f32[4,2], index: 1, kind: input, shape index: {}]   ;;  %s626_s2 = inlined_call_operand.vmem [shape: f32[1,2], index: 2, kind: input, shape index: {}]   ;;  %s627_s3 = inlined_call_operand.hbm [shape: f32[2,2], index: 3, kind: output, shape index: {}]  }
   0x1   :  { %v16_v0 = vld [vmem:[%s625_s1] sm:$0xf]  ;;  %522 = vmatprep.subr.mxu0 %v574_v1  ;;  %524 = vmatprep.mubr.msk.f32.mxu0 %vm575_vm2, %v574_v1 }
   0x2   :  { %v30_v2 = vsel %vm28_vm0, %v16_v0, 0  ;;  %v15_v3 = vld [vmem:[%s624_s0] sm:$0x3] }
   0x3   :  { %8 = vsyncpa [#allocation3], 0  ;;  %v33_v4 = vand.u32 4294901760, %v30_v2  ;;  %v26_v5 = vsel %vm24_vm1, %v15_v3, 0  ;;  %507 = vmatprep.subr.mxu1 %v574_v1  ;;  %509 = vmatprep.mubr.msk.f32.mxu1 %vm575_vm2, %v574_v1  ;;  %v494_v17 = vld [vmem:[%s626_s2] ss:$0 sm:$0xff] }
   0x4   :  { %v98_v6 = vand.u32 4294901760, %v26_v5  ;;  %s576_s16 = smov [#allocation2]   ;;  %vm478_vm3 = vcmask 9216  }
   0x5   :  { %v110_v7 = vsub.f32 %v30_v2, %v33_v4  ;;  %523 = vmatpush3.msra.mxu0 %v33_v4  ;;  %508 = vmatpush3.msra.mxu1 %v33_v4  ;;  %s486_s17 = sshll.u32 %s576_s16, 4  ;;  %s487_s17 = int_to_ptr.vmem [resolvable:$true] %s486_s17 }
   0x6   :  { %v99_v8 = vsub.f32 %v26_v5, %v98_v6  ;;  %512 = vmatprep.subr.mxu1 %v574_v1  ;;  %527 = vmatprep.subr.mxu0 %v574_v1  ;;  %s550_s18 = scalar_lea.vmem %s487_s17, 32  ;;  %p555_p1 = scmp.lt.s32.totalorder %s487_s17, %s487_s17 }
   0x7   :  { %v111_v9 = vand.u32 4294901760, %v110_v7  ;;  %p551_p0 = scmp.ne.s32.totalorder %s487_s17, %s550_s18  ;;  %p556_p2 = scmp.lt.s32.totalorder %s550_s18, %s550_s18 }
   0x8   :  { %v100_v10 = vand.u32 4294901760, %v99_v8 }
   0x9   :  { %v112_v11 = vsub.f32 %v110_v7, %v111_v9  ;;  %p557_p3 = por %p556_p2, %p555_p1 }
   0xa   :  { %525 = vmatmul.mubr.f32.vlgmr.msra.gmra.mrb[0].mxu0 %v100_v10  ;;  %v101_v12 = vsub.f32 %v99_v8, %v100_v10 }
   0xb   :  { %v113_v13 = vand.u32 4294901760, %v112_v11  ;;  %528 = vmatpush3.msra.mxu0 %v111_v9  ;;  %529 = vmatprep.mubr.msk.f32.mxu0 %vm575_vm2, %v574_v1  ;;  %p558_p4 = pnand %p557_p3, %p551_p0 }
   0xc   :  { %v102_v14 = vand.u32 4294901760, %v101_v12  ;;  %532 = vmatprep.subr.mxu0 %v574_v1 }
   0xe   :  { %510 = vmatmul.mubr.f32.vlgmr.msra.gmra.mrb[0].mxu1 %v102_v14 }
   0xf   :  { %513 = vmatpush3.msra.mxu1 %v113_v13  ;;  %514 = vmatprep.mubr.msk.f32.mxu1 %vm575_vm2, %v574_v1 }
  0x10   :  { %517 = vmatprep.subr.mxu1 %v574_v1 }
  0x12   :  { %530 = vmatmul.mubr.f32.vlgmr.msra.gmra.mrb[0].mxu0 %v98_v6 }
  0x13   :  { %533 = vmatpush3.msra.mxu0 %v33_v4  ;;  %534 = vmatprep.mubr.msk.f32.mxu0 %vm575_vm2, %v574_v1 }
  0x16   :  { %515 = vmatmul.mubr.f32.vlgmr.msra.gmra.mrb[0].mxu1 %v98_v6 }
  0x17   :  { %518 = vmatpush3.msra.mxu1 %v110_v7  ;;  %519 = vmatprep.mubr.msk.f32.mxu1 %vm575_vm2, %v574_v1 }
  0x1a   :  { %535 = vmatmul.mubr.f32.vlgmr.msra.gmra.mrb[0].mxu0 %v98_v6 }
  0x1e   :  { %520 = vmatmul.mubr.f32.vlgmr.msra.gmra.mrb[0].mxu1 %v99_v8 }
  0xed   :  { %v474_v15 = vpop.f32.mrb[0].mxu0 }
  0xee   :  { %v536_v16 = vpop.f32.mrb[1].mxu0 }
  0xf1   :  { %v254_v18 = vpop.f32.mrb[0].mxu1 }
  0xf2   :  { %v537_v19 = vadd.f32 %v494_v17, %v254_v18  ;;  %v521_v20 = vpop.f32.mrb[1].mxu1 }
  0xf4   :  { %v538_v21 = vadd.f32 %v537_v19, %v474_v15 }
  0xf6   :  { %479 = vst.msk [vmem:[#allocation2] sm:$0x3] %vm478_vm3, %v538_v21 }
  0xf7   :  { %561 = shalt.err (!%p558_p4)
}
  0xf8   :  { %s562_s2 = scalar_lea.hbm %s627_s3, 32 }
  0xf9   :  { %p563_p5 = scmp.ne.s32.totalorder %s627_s3, %s562_s2  ;;  %p566_p6 = scmp.lt.u32.totalorder %s562_s2, %s627_s3 }
  0xfb   :  { %p568_p7 = pnand %p566_p6, %p563_p5 }
  0xfd   :  { %571 = shalt.err (!%p568_p7)
}
  0xfe   :  { %489 = dma.vmem_to_hbm [thread:$0]  %s487_s17, 32, %s627_s3, [#allocation3]  }
  0xff   :  { %572 = dma.done.wait [#allocation3], 32  }
 0x100   :  { %573 = vsyncadd [#allocation3], 4294967264 }
 0x101   :  { %493 = vsyncpa [#allocation3], 1 }

</bundles_post_ra>
